<compile_context>
chip_gen: v6e
topology: v6e:2x2x1
jax: 0.10.0
libtpu: 0.0.40
codegen_flags: <defaults>
</compile_context>

<pallas_src>
import functools

import jax
import jax.numpy as jnp
from jax.experimental import pallas as pl
from jax.experimental.pallas import tpu as pltpu

_LANE = 128
_SUBLANE = 8


def _round_up(x, m):
    return ((x + m - 1) // m) * m


def _default_vmem_budget():
    """Usable VMEM (bytes) for the tile plan, with headroom for the compiler."""
    try:
        cap = pltpu.get_tpu_info().vmem_capacity_bytes  # 128 MiB v5e/v6e, 64 MiB v7x
    except Exception:
        cap = 64 << 20
    return min(int(cap * 0.6), 96 << 20)


# ----------------------------------------------------------------------------
# Kernels
# ----------------------------------------------------------------------------
def _wslinear_kernel_single(x_ref, w_ref, b_ref, o_ref, *, scale):
    """K axis collapsed: one dot per output tile, epilogue fused, no scratch."""
    acc = jnp.dot(x_ref[...], w_ref[...], preferred_element_type=jnp.float32)
    o_ref[...] = (acc * scale + b_ref[...]).astype(o_ref.dtype)


def _wslinear_kernel_kloop(x_ref, w_ref, b_ref, o_ref, acc_ref, *, scale):
    """K-tiled reduction with a resident f32 VMEM accumulator."""
    k = pl.program_id(2)

    @pl.when(k == 0)
    def _():
        acc_ref[...] = jnp.zeros_like(acc_ref)

    acc_ref[...] += jnp.dot(x_ref[...], w_ref[...],
                            preferred_element_type=jnp.float32)

    @pl.when(k == pl.num_programs(2) - 1)
    def _():
        o_ref[...] = (acc_ref[...] * scale + b_ref[...]).astype(o_ref.dtype)


# ----------------------------------------------------------------------------
# One-time parameter preparation (module init time)
# ----------------------------------------------------------------------------
def wslinear_prepare(weight, bias, *, compute_dtype=jnp.bfloat16,
                     tn_target=1024, tk_target=2048):
    """Cast, pad, and relayout the static parameters once (hoisted per-call cost).

    weight: (out_features, in_features);  bias: (out_features,)
    Returns a params dict consumed by `wslinear_apply`.
    """
    N, K = weight.shape
    # Pad K so that either the whole axis collapses into one tile, or
    # 512-multiple K tiles divide it exactly (no per-call x/w re-pads later).
    if K <= tk_target:
        K_pad = _round_up(K, _LANE)
    else:
        K_pad = _round_up(K, 512)
    tn = min(tn_target, _round_up(N, _LANE))
    N_pad = _round_up(N, tn)

    w = weight.astype(compute_dtype)
    if (N_pad, K_pad) != (N, K):
        w = jnp.pad(w, ((0, N_pad - N), (0, K_pad - K)))
    # (K_pad, N_pad): plain contraction on the leading dim of the weight tile,
    # so the kernel never pays per-tile XLU transposes on the MXU feed path.
    w_kn = jnp.transpose(w)

    b_row = bias.astype(jnp.float32).reshape(1, N)
    if N_pad != N:
        b_row = jnp.pad(b_row, ((0, 0), (0, N_pad - N)))

    return dict(
        w_kn=w_kn, b_row=b_row,
        in_features=K, out_features=N,
        tn=tn, scale=(2.0 / K) ** 0.5,
        compute_dtype=compute_dtype,
    )


# ----------------------------------------------------------------------------
# Forward pass
# ----------------------------------------------------------------------------
def wslinear_apply(params, x, *, tm_target=512, vmem_budget_bytes=None,
                   tk_override=None, out_dtype=None):
    """y = (x * scale) @ weight.T + bias, via a tiled Pallas matmul."""
    w_kn = params["w_kn"]
    b_row = params["b_row"]
    K = params["in_features"]
    N = params["out_features"]
    scale = params["scale"]
    tn = params["tn"]
    compute_dtype = params["compute_dtype"]

    K_pad, N_pad = w_kn.shape
    M = x.shape[0]
    assert x.shape[1] == K, (x.shape, K)

    out_dtype = x.dtype if out_dtype is None else out_dtype
    out_isz = jnp.dtype(out_dtype).itemsize
    c_isz = jnp.dtype(compute_dtype).itemsize

    if vmem_budget_bytes is None:
        vmem_budget_bytes = _default_vmem_budget()

    # ---- tile selection -----------------------------------------------------
    if M >= _LANE:
        tm = min(tm_target, _round_up(M, _LANE))   # multiples of 128: full MXU rows
    else:
        tm = _round_up(M, _SUBLANE)
    M_pad = _round_up(M, tm)

    def footprint(tm_, tn_, tk_, with_acc):
        f = 2 * tm_ * tk_ * c_isz          # x tiles (double-buffered)
        f += 2 * tk_ * tn_ * c_isz         # w tiles
        f += 2 * tm_ * tn_ * out_isz       # out tiles
        f += 2 * tn_ * 4                   # bias tiles
        if with_acc:
            f += tm_ * tn_ * 4             # f32 accumulator scratch
        return f

    if tk_override is not None:
        tk = tk_override
    elif footprint(tm, tn, K_pad, with_acc=False) <= vmem_budget_bytes:
        tk = K_pad                         # collapse K: x panel stays resident
    else:
        tk = 512
        for cand in (2048, 1536, 1024):
            if K_pad % cand == 0 and footprint(tm, tn, cand, True) <= vmem_budget_bytes:
                tk = cand
                break
    assert K_pad % tk == 0, (K_pad, tk)

    gm, gn, gk = M_pad // tm, N_pad // tn, K_pad // tk

    # v7x has 2 TensorCores; give a 'parallel' axis >= 2 blocks when possible.
    if gm * gn == 1 and N_pad % (2 * _LANE) == 0 and N_pad > _LANE:
        tn = N_pad // 2
        gn = 2

    # ---- per-call input prep (only x; weights were prepared once) -----------
    xp = x.astype(compute_dtype)
    if (M_pad, K_pad) != (M, K):
        xp = jnp.pad(xp, ((0, M_pad - M), (0, K_pad - K)))

    # ---- cost estimate with real reuse factors -------------------------------
    bytes_accessed = (gn * M_pad * K_pad * c_isz     # x streamed once per N-tile column
                      + gm * K_pad * N_pad * c_isz   # w streamed once per M-tile row
                      + gm * N_pad * 4               # bias
                      + M_pad * N_pad * out_isz)     # output writeback
    cost = pl.CostEstimate(flops=2 * M_pad * N_pad * K_pad,
                           transcendentals=0,
                           bytes_accessed=int(bytes_accessed))

    fp = footprint(tm, tn, tk, with_acc=(gk > 1))
    vmem_limit = int(min(100 << 20, max(32 << 20, fp + (16 << 20))))

    # ---- pallas_call ----------------------------------------------------------
    if gk == 1:
        kernel = functools.partial(_wslinear_kernel_single, scale=scale)
        grid_spec = pltpu.PrefetchScalarGridSpec(
            num_scalar_prefetch=0,
            grid=(gm, gn),
            in_specs=[
                pl.BlockSpec((tm, tk), lambda i, j: (i, 0)),   # x  (M, K)
                pl.BlockSpec((tk, tn), lambda i, j: (0, j)),   # w  (K, N)
                pl.BlockSpec((1, tn), lambda i, j: (0, j)),    # bias
            ],
            out_specs=pl.BlockSpec((tm, tn), lambda i, j: (i, j)),
            scratch_shapes=[],
        )
        dims = ("parallel", "parallel")
    else:
        kernel = functools.partial(_wslinear_kernel_kloop, scale=scale)
        grid_spec = pltpu.PrefetchScalarGridSpec(
            num_scalar_prefetch=0,
            grid=(gm, gn, gk),
            in_specs=[
                pl.BlockSpec((tm, tk), lambda i, j, k: (i, k)),   # x  (M, K)
                pl.BlockSpec((tk, tn), lambda i, j, k: (k, j)),   # w  (K, N)
                pl.BlockSpec((1, tn), lambda i, j, k: (0, j)),    # bias
            ],
            out_specs=pl.BlockSpec((tm, tn), lambda i, j, k: (i, j)),
            scratch_shapes=[pltpu.VMEM((tm, tn), jnp.float32)],
        )
        dims = ("parallel", "parallel", "arbitrary")

    out = pl.pallas_call(
        kernel,
        out_shape=jax.ShapeDtypeStruct((M_pad, N_pad), out_dtype),
        grid_spec=grid_spec,
        compiler_params=pltpu.CompilerParams(
            dimension_semantics=dims,
            vmem_limit_bytes=vmem_limit,
        ),
        cost_estimate=cost,
    )(xp, w_kn, b_row)

    if (M_pad, N_pad) != (M, N):
        out = out[:M, :N]
    return out


# ----------------------------------------------------------------------------
# Self-test
# ----------------------------------------------------------------------------
def _check(key, batch, in_features, out_features, *, nonzero_bias=False,
           tk_override=None):
    kx, kw, kb = jax.random.split(key, 3)
    x = jax.random.normal(kx, (batch, in_features), dtype=jnp.float32)
    weight = jax.random.normal(kw, (out_features, in_features), dtype=jnp.float32)
    if nonzero_bias:
        bias = jax.random.normal(kb, (out_features,), dtype=jnp.float32)
    else:
        bias = jnp.zeros((out_features,), dtype=jnp.float32)   # nn.init.zeros_

    params = wslinear_prepare(weight, bias)
    out = jax.block_until_ready(wslinear_apply(params, x, tk_override=tk_override))

    scale = (2.0 / in_features) ** 0.5
    ref = (x * scale) @ weight.T + bias
    assert out.shape == (batch, out_features), out.shape
    # bf16 MXU inputs with f32 accumulation -> loosened tolerance vs f32 ref.
    err = float(jnp.max(jnp.abs(out - ref)))
    assert jnp.allclose(out, ref, atol=5e-2, rtol=5e-2), err


if __name__ == "__main__":
    key = jax.random.PRNGKey(0)
    k0, k1, k2 = jax.random.split(key, 3)

    # Small shape matching the module defaults (padding + K-collapse path).
    _check(k0, batch=8, in_features=32, out_features=64)

    # Collapsed-K path with a non-zero bias and megacore N split.
    _check(k1, batch=32, in_features=512, out_features=256, nonzero_bias=True)

    # Force the K-tiled accumulator path (grid_k > 1) on small shapes.
    _check(k2, batch=16, in_features=512, out_features=256, nonzero_bias=True,
           tk_override=256)

    print("KERNEL_OK")
</pallas_src>

<mosaic_0001>
module attributes {stable_mosaic.version = 11 : i64} {
  func.func @_wslinear_kernel_single(%arg0: i32, %arg1: i32, %arg2: memref<8x128xbf16, #tpu.memory_space<vmem>>, %arg3: memref<128x128xbf16, #tpu.memory_space<vmem>>, %arg4: memref<1x128xf32, #tpu.memory_space<vmem>>, %arg5: memref<8x128xf32, #tpu.memory_space<vmem>>) attributes {dimension_semantics = [#tpu.dimension_semantics<parallel>, #tpu.dimension_semantics<parallel>], iteration_bounds = array<i64: 1, 1>, scalar_prefetch = 0 : i64, scratch_operands = 0 : i64, tpu.core_type = #tpu.core_type<tc>, window_params = [{transform_indices = @transform_0, window_bounds = array<i64: 8, 128>}, {transform_indices = @transform_1, window_bounds = array<i64: 128, 128>}, {transform_indices = @transform_2, window_bounds = array<i64: 1, 128>}, {transform_indices = @transform_3, window_bounds = array<i64: 8, 128>}]} {
    %c0 = arith.constant 0 : index
    %c0_0 = arith.constant 0 : index
    %0 = vector.load %arg2[%c0, %c0_0] : memref<8x128xbf16, #tpu.memory_space<vmem>>, vector<8x128xbf16>
    %c0_1 = arith.constant 0 : index
    %c0_2 = arith.constant 0 : index
    %1 = vector.load %arg3[%c0_1, %c0_2] : memref<128x128xbf16, #tpu.memory_space<vmem>>, vector<128x128xbf16>
    %cst = arith.constant dense<0.000000e+00> : vector<8x128xf32>
    %2 = tpu.matmul %0, %1, %cst {dimension_numbers = #tpu.dot_dimension_numbers<[1], [0], [0], [1], [0, 0, 1, 1], [], []>} : vector<8x128xbf16>, vector<128x128xbf16>, vector<8x128xf32> -> vector<8x128xf32>
    %cst_3 = arith.constant 2.500000e-01 : f32
    %3 = vector.broadcast %cst_3 : f32 to vector<8x128xf32>
    %4 = arith.mulf %2, %3 : vector<8x128xf32>
    %c0_4 = arith.constant 0 : index
    %c0_5 = arith.constant 0 : index
    %5 = vector.load %arg4[%c0_4, %c0_5] : memref<1x128xf32, #tpu.memory_space<vmem>>, vector<1x128xf32>
    %6 = vector.broadcast %5 : vector<1x128xf32> to vector<8x128xf32>
    %7 = arith.addf %4, %6 : vector<8x128xf32>
    %c0_6 = arith.constant 0 : index
    %c0_7 = arith.constant 0 : index
    %8 = vector.load %arg5[%c0_6, %c0_7] : memref<8x128xf32, #tpu.memory_space<vmem>>, vector<8x128xf32>
    tpu.vector_store %arg5[%c0_6, %c0_7], %7 {strides = array<i32>} : memref<8x128xf32, #tpu.memory_space<vmem>>, vector<8x128xf32>,
    return
  }
  func.func @transform_0(%arg0: i32, %arg1: i32) -> (i32, i32) {
    %c0_i32 = arith.constant 0 : i32
    %c0_i32_0 = arith.constant 0 : i32
    return %arg0, %c0_i32 : i32, i32
  }
  func.func @transform_1(%arg0: i32, %arg1: i32) -> (i32, i32) {
    %c0_i32 = arith.constant 0 : i32
    %c0_i32_0 = arith.constant 0 : i32
    return %c0_i32, %arg1 : i32, i32
  }
  func.func @transform_2(%arg0: i32, %arg1: i32) -> (i32, i32) {
    %c0_i32 = arith.constant 0 : i32
    %c0_i32_0 = arith.constant 0 : i32
    return %c0_i32, %arg1 : i32, i32
  }
  func.func @transform_3(%arg0: i32, %arg1: i32) -> (i32, i32) {
    %c0_i32 = arith.constant 0 : i32
    return %arg0, %arg1 : i32, i32
  }
}

</mosaic_0001>

<bundles_post_ra>
// kernel: tpu_custom_call.1
= control target key start
LH: loop header
LB: loop body
LE: loop exit
PB: predicated region body
PF: predicated region fallthrough
CT: control target
= control target key end

     0   :  { %8 = vsyncpa [#allocation3], 0  ;;  %s331_s0 = inlined_call_operand.hbm [shape: bf16[8,128], index: 0, kind: input, shape index: {}]   ;;  %s332_s1 = inlined_call_operand.hbm [shape: bf16[128,128], index: 1, kind: input, shape index: {}]   ;;  %s333_s2 = inlined_call_operand.vmem [shape: f32[1,128], index: 2, kind: input, shape index: {}]   ;;  %s334_s3 = inlined_call_operand.hbm [shape: f32[8,128], index: 3, kind: output, shape index: {}]  }
   0x1   :  { %9 = vsyncpa [#allocation6], 0 }
   0x2   :  { %10 = vsyncpa [#allocation4], 0  ;;  %s292_s12 = smov [#allocation2]   ;;  %s293_s14 = smov [#allocation5]  }
   0x3   :  { %s17_s13 = sshll.u32 %s292_s12, 4  ;;  %s26_s15 = sshll.u32 %s293_s14, 4  ;;  %s18_s13 = int_to_ptr.vmem [resolvable:$true] %s17_s13  ;;  %s27_s15 = int_to_ptr.vmem [resolvable:$true] %s26_s15 }
   0x4   :  { %s234_s16 = scalar_lea.vmem %s18_s13, 64  ;;  %p239_p1 = scmp.lt.s32.totalorder %s18_s13, %s18_s13 }
   0x5   :  { %p235_p0 = scmp.ne.s32.totalorder %s18_s13, %s234_s16  ;;  %p240_p2 = scmp.lt.s32.totalorder %s234_s16, %s234_s16 }
   0x7   :  { %p241_p3 = por %p240_p2, %p239_p1 }
   0x9   :  { %p242_p4 = pnand %p241_p3, %p235_p0 }
   0xb   :  { %245 = shalt.err (!%p242_p4)
}
   0xc   :  { %20 = dma.hbm_to_vmem [thread:$0]  %s331_s0, 64, %s18_s13, [#allocation3]  }
   0xd   :  { %s254_s19 = scalar_lea.vmem %s27_s15, 1024  ;;  %p259_p6 = scmp.lt.s32.totalorder %s27_s15, %s27_s15 }
   0xe   :  { %p255_p5 = scmp.ne.s32.totalorder %s27_s15, %s254_s19  ;;  %p260_p7 = scmp.lt.s32.totalorder %s254_s19, %s254_s19 }
  0x10   :  { %p261_p8 = por %p260_p7, %p259_p6 }
  0x12   :  { %p262_p9 = pnand %p261_p8, %p255_p5 }
  0x14   :  { %265 = shalt.err (!%p262_p9)
}
  0x15   :  { %s294_s20 = smov 64   ;;  %s295_s21 = smov 4  }
  0x16   :  { %32 = dma.hbm_to_vmem [thread:$0]  %s332_s1, 1024, %s27_s15, [#allocation6], %s294_s20, %s294_s20, %s295_s21  }
  0x17   :  { %286 = dma.done.wait [#allocation3], 64  }
  0x18   :  { %287 = vsyncadd [#allocation3], 4294967232 }
  0x19   :  { %288 = dma.done.wait [#allocation6], 1024  }
  0x1a   :  { %289 = vsyncadd [#allocation6], 4294966272  ;;  %v296_v0 = vmov 0.0   ;;  %vm297_vm0 = vmmov 0   ;;  %v218_v1 = vld [vmem:[#allocation5 + $0x38] sm:$0xff]   ;;  %v219_v2 = vld [vmem:[#allocation5 + $0x30] sm:$0xff]  }
  0x1b   :  { %191 = vmatprep.subr.bf16.mxu0 %v296_v0  ;;  %207 = vmatprep.mubr.msk.bf16.mxu0 %vm297_vm0, %v296_v0  ;;  %v220_v3 = vld [vmem:[#allocation5 + $0x28] sm:$0xff]   ;;  %v221_v4 = vld [vmem:[#allocation5 + $0x20] sm:$0xff]   ;;  %v222_v5 = vld [vmem:[#allocation5 + $0x18] sm:$0xff]   ;;  %s298_s24 = smov [#allocation7]  }
  0x1c   :  { %192 = vmatpush3.bf16.msra.mxu0 %v218_v1  ;;  %v223_v6 = vld [vmem:[#allocation5 + $0x10] sm:$0xff]   ;;  %v224_v7 = vld [vmem:[#allocation5 + $0x8] sm:$0xff]   ;;  %v225_v8 = vld [vmem:[#allocation5] sm:$0xff]   ;;  %s163_s25 = sshll.u32 %s298_s24, 4  ;;  %s164_s25 = int_to_ptr.vmem [resolvable:$true] %s163_s25 }
  0x1d   :  { %193 = vmatprep.subr.bf16.mxu0 %v296_v0  ;;  %v42_v9 = vld [vmem:[#allocation2] sm:$0xf]  ;;  %s266_s26 = scalar_lea.vmem %s164_s25, 128  ;;  %p271_p11 = scmp.lt.s32.totalorder %s164_s25, %s164_s25 }
  0x1e   :  { %v181_v11 = vld [vmem:[%s333_s2] ss:$0 sm:$0xff]  ;;  %p267_p10 = scmp.ne.s32.totalorder %s164_s25, %s266_s26  ;;  %p272_p12 = scmp.lt.s32.totalorder %s266_s26, %s266_s26 }
  0x20   :  { %194 = vmatpush3.bf16.msra.mxu0 %v219_v2  ;;  %p273_p13 = por %p272_p12, %p271_p11 }
  0x21   :  { %195 = vmatprep.subr.bf16.mxu0 %v296_v0 }
  0x22   :  { %p274_p0 = pnand %p273_p13, %p267_p10 }
  0x24   :  { %196 = vmatpush3.bf16.msra.mxu0 %v220_v3 }
  0x25   :  { %197 = vmatprep.subr.bf16.mxu0 %v296_v0 }
  0x28   :  { %198 = vmatpush3.bf16.msra.mxu0 %v221_v4 }
  0x29   :  { %199 = vmatprep.subr.bf16.mxu0 %v296_v0 }
  0x2c   :  { %200 = vmatpush3.bf16.msra.mxu0 %v222_v5 }
  0x2d   :  { %201 = vmatprep.subr.bf16.mxu0 %v296_v0 }
  0x30   :  { %202 = vmatpush3.bf16.msra.mxu0 %v223_v6 }
  0x31   :  { %203 = vmatprep.subr.bf16.mxu0 %v296_v0 }
  0x34   :  { %204 = vmatpush3.bf16.msra.mxu0 %v224_v7 }
  0x35   :  { %205 = vmatprep.subr.bf16.mxu0 %v296_v0 }
  0x38   :  { %206 = vmatpush3.bf16.msra.mxu0 %v225_v8 }
  0x3b   :  { %208 = vmatmul.mubr.bf16.vlgmr.msra.gmra.mxu0 %v42_v9 }
  0xfb   :  { %v141_v10 = vpop.f32.mrf.mxu0 }
  0xfc   :  { %v147_v12 = vmul.f32 0.25, %v141_v10 }
  0xfd   :  { %v209_v13 = vpop.f32.mrf.mxu0 }
  0xfe   :  { %v155_v14 = vadd.f32 %v181_v11, %v147_v12 }
  0xff   :  { %v144_v15 = vpop.f32.mrf.mxu0 }
 0x100   :  { %156 = vst [vmem:[#allocation7] sm:$0xff] %v155_v14 }
 0x101   :  { %v210_v16 = vpop.f32.mrf.mxu0 }
 0x102   :  { %277 = shalt.err (!%p274_p0)
}
 0x103   :  { %166 = dma.vmem_to_hbm [thread:$0]  %s164_s25, 128, %s334_s3, [#allocation4]  }
 0x104   :  { %290 = dma.done.wait [#allocation4], 128  }
 0x105   :  { %291 = vsyncadd [#allocation4], 4294967168 }
 0x106   :  { %170 = vsyncpa [#allocation3], 1 }
 0x107   :  { %171 = vsyncpa [#allocation6], 1 }
 0x108   :  { %172 = vsyncpa [#allocation4], 1 }

</bundles_post_ra>
